<compile_context>
chip_gen: v6e
topology: v6e:2x2x1
jax: 0.10.0
libtpu: 0.0.40
codegen_flags: <defaults>
</compile_context>

<pallas_src>
import functools

import numpy as np

import jax
import jax.numpy as jnp
from jax.experimental import pallas as pl
from jax.experimental.pallas import tpu as pltpu


def _pad_amounts(img_size, w, h):
    """Exact ImgPad / torchvision centering: floor left/top, remainder right/bottom,
    negative padding clamped to zero (image is NOT cropped)."""
    left = (img_size - w) // 2
    right = img_size - w - left
    top = (img_size - h) // 2
    bottom = img_size - h - top
    left, top = max(left, 0), max(top, 0)
    right, bottom = max(right, 0), max(bottom, 0)
    return left, right, top, bottom


def _vmem_capacity_bytes():
    """Per-core VMEM capacity; conservative fallback if the query fails."""
    try:
        return int(pltpu.get_tpu_info().vmem_capacity_bytes)
    except Exception:
        return 64 << 20  # v7x per-TC size; safe lower bound for v5e/v6e too


def _choose_bc(nc, in_bytes, out_bytes, vmem_budget):
    """Pick how many channel-images to process per grid step.

    Constraints: BC divides nc; double-buffered (in+out) blocks fit the VMEM
    budget; output block targets ~4 MiB; prefer an even grid length (v7x 2-TC
    balance), then the largest BC.
    """
    per_chan = 2 * (in_bytes + out_bytes)  # double-buffered in + out per channel
    cap = max(1, vmem_budget // max(per_chan, 1))
    target = max(1, (4 << 20) // max(out_bytes, 1))  # ~4 MiB output block
    bc_max = max(1, min(cap, target, nc))

    divisors = sorted((d for d in range(1, nc + 1) if nc % d == 0), reverse=True)
    # Preference 1: largest divisor <= bc_max giving an even grid length.
    for d in divisors:
        if d <= bc_max and (nc // d) % 2 == 0:
            return d
    # Preference 2: largest divisor <= bc_max.
    for d in divisors:
        if d <= bc_max:
            return d
    return 1


def _img_pad_kernel(x_ref, o_ref, *, pad_top, pad_left, in_h, in_w):
    # x_ref: (BC, in_h, in_w) VMEM tile, o_ref: (BC, out_h, out_w) VMEM tile.
    bc, out_h, out_w = o_ref.shape
    dt = o_ref.dtype
    pad_bottom = out_h - pad_top - in_h
    pad_right = out_w - pad_left - in_w

    # Zero only the border strips (pad amounts are static Python ints, so these
    # are compile-time branches and static-offset stores).  The HBM writeback of
    # the output block still happens exactly once.
    if pad_top > 0:
        o_ref[:, 0:pad_top, :] = jnp.zeros((bc, pad_top, out_w), dt)
    if pad_bottom > 0:
        o_ref[:, pad_top + in_h:out_h, :] = jnp.zeros((bc, pad_bottom, out_w), dt)
    if pad_left > 0:
        o_ref[:, pad_top:pad_top + in_h, 0:pad_left] = jnp.zeros((bc, in_h, pad_left), dt)
    if pad_right > 0:
        o_ref[:, pad_top:pad_top + in_h, pad_left + in_w:out_w] = (
            jnp.zeros((bc, in_h, pad_right), dt))

    # Interior copy at static offsets (single rectangular store).
    o_ref[:, pl.ds(pad_top, in_h), pl.ds(pad_left, in_w)] = x_ref[...]


def img_pad(x, img_size):
    """Center zero-pad an NCHW batch to (img_size, img_size) (ImgPad.forward).

    x: (N, C, H, W) array.  Returns (N, C, out_h, out_w) where out_* == img_size
    whenever the input is smaller, and the input size otherwise (clamped pads).
    """
    n, c, h, w = x.shape
    left, right, top, bottom = _pad_amounts(img_size, w, h)

    # Early-out: no padding needed -> no kernel, no copy.
    if left == 0 and right == 0 and top == 0 and bottom == 0:
        return x

    out_h = h + top + bottom
    out_w = w + left + right

    nc = n * c
    x3 = x.reshape(nc, h, w)

    itemsize = jnp.dtype(x.dtype).itemsize
    in_bytes = h * w * itemsize
    out_bytes = out_h * out_w * itemsize

    vmem_budget = int(_vmem_capacity_bytes() * 3 // 4)
    bc = _choose_bc(nc, in_bytes, out_bytes, vmem_budget)

    # Double-buffered input + output blocks, plus slack, capped at the
    # generation-aware budget.
    block_bytes = 2 * bc * (in_bytes + out_bytes)
    vmem_limit = int(min(max(block_bytes + (4 << 20), 16 << 20), vmem_budget))

    # TODO(synk): add an H-tiled fallback (second grid axis over out_h row blocks)
    # for fp32 img_size >~ 1.5-2k where even BC=1 exceeds v7x's 64 MiB VMEM.

    kernel = functools.partial(
        _img_pad_kernel, pad_top=top, pad_left=left, in_h=h, in_w=w
    )

    out3 = pl.pallas_call(
        kernel,
        out_shape=jax.ShapeDtypeStruct((nc, out_h, out_w), x.dtype),
        grid_spec=pltpu.PrefetchScalarGridSpec(
            num_scalar_prefetch=0,
            grid=(nc // bc,),  # single large parallel axis, BC images per step
            in_specs=[pl.BlockSpec((bc, h, w), lambda i: (i, 0, 0))],
            out_specs=pl.BlockSpec((bc, out_h, out_w), lambda i: (i, 0, 0)),
        ),
        compiler_params=pltpu.CompilerParams(
            dimension_semantics=("parallel",),
            vmem_limit_bytes=vmem_limit,
        ),
    )(x3)

    return out3.reshape(n, c, out_h, out_w)


def img_pad_ref(x, img_size):
    """Pure-JAX reference (same semantics) for correctness checking."""
    _, _, h, w = x.shape
    left, right, top, bottom = _pad_amounts(img_size, w, h)
    return jnp.pad(x, ((0, 0), (0, 0), (top, bottom), (left, right)))


if __name__ == "__main__":
    key = jax.random.PRNGKey(0)
    k1, k2, k3 = jax.random.split(key, 3)

    img_size = 32

    # Primary example: batch=2, channels=4, 16x16 input -> centered 32x32 output.
    x = jax.random.normal(k1, (2, 4, 16, 16), dtype=jnp.float32)
    y = jax.block_until_ready(img_pad(x, img_size))
    y_ref = img_pad_ref(x, img_size)
    np.testing.assert_array_equal(np.asarray(y), np.asarray(y_ref))
    assert y.shape == (2, 4, 32, 32)

    # Asymmetric / odd-size case: exercises the "extra pixel goes right/bottom" rule.
    x2 = jax.random.normal(k2, (1, 3, 15, 9), dtype=jnp.float32)
    y2 = jax.block_until_ready(img_pad(x2, img_size))
    y2_ref = img_pad_ref(x2, img_size)
    np.testing.assert_array_equal(np.asarray(y2), np.asarray(y2_ref))
    assert y2.shape == (1, 3, 32, 32)

    # No-pad early-out: input already img_size x img_size -> returned unchanged.
    x3 = jax.random.normal(k3, (1, 2, 32, 32), dtype=jnp.float32)
    y3 = jax.block_until_ready(img_pad(x3, img_size))
    np.testing.assert_array_equal(np.asarray(y3), np.asarray(x3))

    print("KERNEL_OK")
</pallas_src>

<mosaic_0001>
module attributes {stable_mosaic.version = 11 : i64} {
  func.func @_img_pad_kernel(%arg0: i32, %arg1: memref<4x16x16xf32, #tpu.memory_space<vmem>>, %arg2: memref<4x32x32xf32, #tpu.memory_space<vmem>>) attributes {dimension_semantics = [#tpu.dimension_semantics<parallel>], iteration_bounds = array<i64: 2>, scalar_prefetch = 0 : i64, scratch_operands = 0 : i64, tpu.core_type = #tpu.core_type<tc>, window_params = [{transform_indices = @transform_0, window_bounds = array<i64: 4, 16, 16>}, {transform_indices = @transform_1, window_bounds = array<i64: 4, 32, 32>}]} {
    %cst = arith.constant 0.000000e+00 : f32
    %0 = vector.broadcast %cst : f32 to vector<4x8x32xf32>
    %c0 = arith.constant 0 : index
    %c0_0 = arith.constant 0 : index
    %c0_1 = arith.constant 0 : index
    %1 = vector.load %arg2[%c0, %c0_0, %c0_1] : memref<4x32x32xf32, #tpu.memory_space<vmem>>, vector<4x8x32xf32>
    tpu.vector_store %arg2[%c0, %c0_0, %c0_1], %0 {strides = array<i32>} : memref<4x32x32xf32, #tpu.memory_space<vmem>>, vector<4x8x32xf32>,
    %cst_2 = arith.constant 0.000000e+00 : f32
    %2 = vector.broadcast %cst_2 : f32 to vector<4x8x32xf32>
    %c0_3 = arith.constant 0 : index
    %c24 = arith.constant 24 : index
    %c0_4 = arith.constant 0 : index
    %3 = vector.load %arg2[%c0_3, %c24, %c0_4] : memref<4x32x32xf32, #tpu.memory_space<vmem>>, vector<4x8x32xf32>
    tpu.vector_store %arg2[%c0_3, %c24, %c0_4], %2 {strides = array<i32>} : memref<4x32x32xf32, #tpu.memory_space<vmem>>, vector<4x8x32xf32>,
    %cst_5 = arith.constant 0.000000e+00 : f32
    %4 = vector.broadcast %cst_5 : f32 to vector<4x16x8xf32>
    %c0_6 = arith.constant 0 : index
    %c8 = arith.constant 8 : index
    %c0_7 = arith.constant 0 : index
    %5 = vector.load %arg2[%c0_6, %c8, %c0_7] : memref<4x32x32xf32, #tpu.memory_space<vmem>>, vector<4x16x8xf32>
    tpu.vector_store %arg2[%c0_6, %c8, %c0_7], %4 {strides = array<i32>} : memref<4x32x32xf32, #tpu.memory_space<vmem>>, vector<4x16x8xf32>,
    %cst_8 = arith.constant 0.000000e+00 : f32
    %6 = vector.broadcast %cst_8 : f32 to vector<4x16x8xf32>
    %c0_9 = arith.constant 0 : index
    %c8_10 = arith.constant 8 : index
    %c24_11 = arith.constant 24 : index
    %7 = vector.load %arg2[%c0_9, %c8_10, %c24_11] : memref<4x32x32xf32, #tpu.memory_space<vmem>>, vector<4x16x8xf32>
    tpu.vector_store %arg2[%c0_9, %c8_10, %c24_11], %6 {strides = array<i32>} : memref<4x32x32xf32, #tpu.memory_space<vmem>>, vector<4x16x8xf32>,
    %c0_12 = arith.constant 0 : index
    %c0_13 = arith.constant 0 : index
    %c0_14 = arith.constant 0 : index
    %8 = vector.load %arg1[%c0_12, %c0_13, %c0_14] : memref<4x16x16xf32, #tpu.memory_space<vmem>>, vector<4x16x16xf32>
    %c0_15 = arith.constant 0 : index
    %c8_16 = arith.constant 8 : index
    %c8_17 = arith.constant 8 : index
    %9 = vector.load %arg2[%c0_15, %c8_16, %c8_17] : memref<4x32x32xf32, #tpu.memory_space<vmem>>, vector<4x16x16xf32>
    tpu.vector_store %arg2[%c0_15, %c8_16, %c8_17], %8 {strides = array<i32>} : memref<4x32x32xf32, #tpu.memory_space<vmem>>, vector<4x16x16xf32>,
    return
  }
  func.func @transform_0(%arg0: i32) -> (i32, i32, i32) {
    %c0_i32 = arith.constant 0 : i32
    %c0_i32_0 = arith.constant 0 : i32
    %c0_i32_1 = arith.constant 0 : i32
    return %arg0, %c0_i32, %c0_i32_0 : i32, i32, i32
  }
  func.func @transform_1(%arg0: i32) -> (i32, i32, i32) {
    %c0_i32 = arith.constant 0 : i32
    %c0_i32_0 = arith.constant 0 : i32
    %c0_i32_1 = arith.constant 0 : i32
    return %arg0, %c0_i32, %c0_i32_0 : i32, i32, i32
  }
}

</mosaic_0001>

<bundles_post_ra>
// kernel: tpu_custom_call.1
= control target key start
LH: loop header
LB: loop body
LE: loop exit
PB: predicated region body
PF: predicated region fallthrough
CT: control target
= control target key end

     0   :  { %6 = vsyncpa [#allocation3], 0  ;;  %s709_s0 = inlined_call_operand.hbm [shape: f32[8,16,16], index: 0, kind: input, shape index: {}]   ;;  %s710_s1 = inlined_call_operand.hbm [shape: f32[8,32,32], index: 1, kind: output, shape index: {}]  }
   0x1   :  { %8 = vsyncpa [#allocation3 + $0x1], 0 }
   0x2   :  { %9 = vsyncpa [#allocation4], 0 }
   0x3   :  { %11 = vsyncpa [#allocation4 + $0x1], 0  ;;  %s484_s6 = smov 0   ;;  %s486_s7 = smov 0  }
   0x4   :  { %s488_s8 = smov 0   ;;  %s490_s9 = smov 0  }
   0x5 LB: > { %s505_s10 = sadd.s32 4294967295, %s465_s9   ;;  %s302_s11 = sadd.s32 4294967294, %s465_s9   ;;  %s465_s9 = sphi %s490_s9, %s725_s9   ;;  %s461_s8 = sphi %s488_s8, %s724_s8   ;;  %s457_s7 = sphi %s486_s7, %s723_s7   ;;  %s453_s6 = sphi %s484_s6, %s722_s6  }
   0x6   : > { %s509_s12 = sadd.s32 1, %s465_s9   ;;  %s24_s13 = sadd.s32 1, %s461_s8 }
   0x7   : > { %s21_s14 = ssub.s32 %s465_s9, %s509_s12  ;;  %p31_p0 = scmp.ne.s32.totalorder %s461_s8, %s457_s7 }
   0x8   : > { %p22_p1 = scmp.eq.s32.totalorder %s21_s14, 0  ;;  %p32_p2 = scmp.eq.s32.totalorder %s465_s9, 0 }
   0x9   : > { %p37_p3 = scmp.ne.s32.totalorder %s457_s7, %s453_s6  ;;  %p38_p4 = scmp.eq.s32.totalorder %s505_s10, 0 }
   0xa   : > { %s521_s15 = scalar_select %p22_p1, %s461_s8, %s24_s13  }
   0xb   : > { %p523_p5 = por %p32_p2, %p31_p0  ;;  %p527_p6 = por %p38_p4, %p37_p3 }
   0xc   : > { %p61_p7 = scmp.eq.s32.totalorder %s505_s10, 1  ;;  %p67_p8 = scmp.eq.s32.totalorder %s302_s11, 1 }
   0xd   : > { %s714_s17 = scalar_select %p527_p6, 1, 0 }
   0xe   : > { %p334_p10 = scmp.lt.s32.totalorder %s465_s9, 2  ;;  %p534_p11 = por %p61_p7, %p31_p0 }
   0xf   : > { %p538_p12 = por %p67_p8, %p37_p3  ;;  %s87_s20 = sand.u32 1, %s461_s8  }
  0x10   : > { %s715_s18 = scalar_select %p534_p11, 1, 0 }
  0x11   : > { %s716_s19 = scalar_select %p538_p12, 1, 0 }
  0x12   : > { %s319_s21 = sshll.u32 %s465_s9, 10  ;;  %s305_s22 = sshll.u32 %s87_s20, 6 }
  0x13   : > { %s547_s25 = scalar_lea.hbm %s709_s0, %s319_s21  ;;  %s91_s26 = scalar_lea.vmem [#allocation2], %s305_s22 }
  0x14   : > { %s99_s27 = sshll.u32 %s91_s26, 4  ;;  %p551_p13 = pnand %p334_p10, %p523_p5  ;;  %s555_s27 = int_to_ptr.vmem [resolvable:$true] %s99_s27 }
  0x15   : > { %s557_s29 = scalar_lea.sflag [#allocation3], %s87_s20  ;;  %s373_s30 = scalar_lea.hbm %s547_s25, 1024 }
  0x16   : > { %p374_p0 = scmp.ne.s32.totalorder %s547_s25, %s373_s30  ;;  %p375_p1 = pneg %p551_p13 }
  0x17   : > { %s378_s4 = scalar_lea.hbm %s709_s0, 2048  ;;  %p379_p4 = scmp.lt.s32.totalorder %s547_s25, %s709_s0 }
  0x18   : > { %p376_p2 = pnand %p375_p1, %p374_p0  ;;  %p380_p5 = scmp.lt.s32.totalorder %s378_s4, %s373_s30 }
  0x1a   : > { %p377_p3 = pneg %p376_p2  ;;  %p381_p7 = por %p380_p5, %p379_p4 }
  0x1c   : > { %p382_p8 = pnand %p381_p7, %p377_p3 }
  0x1e   : > { %385 = shalt.err (!%p382_p8)
}
  0x1f   : > { %s386_s13 = scalar_lea.vmem %s555_s27, 1024  ;;  %s467_s14 = smov [#allocation2]  }
  0x20   : > { %p387_p10 = scmp.ne.s32.totalorder %s555_s27, %s386_s13  ;;  %s391_s16 = sshll.u32 %s467_s14, 4  ;;  %s392_s16 = int_to_ptr.vmem [resolvable:$false] %s391_s16 }
  0x21   : > { %s393_s20 = scalar_lea.vmem %s392_s16, 2048  ;;  %p394_p2 = scmp.lt.s32.totalorder %s555_s27, %s392_s16 }
  0x22   : > { %p389_p9 = pnand %p387_p10, %p375_p1  ;;  %p395_p12 = scmp.lt.s32.totalorder %s393_s20, %s386_s13 }
  0x24   : > { %p390_p0 = pneg %p389_p9  ;;  %p396_p11 = por %p395_p12, %p394_p2 }
  0x26   : > { %p397_p6 = pnand %p396_p11, %p390_p0 }
  0x28   : > { %400 = shalt.err (!%p397_p6)
}
  0x29   : > { %s468_s21 = smov 128   ;;  %s469_s22 = smov 8  }
  0x2a   : > { %329 = dma.hbm_to_vmem [thread:$0]  (!%p551_p13), %s547_s25, 1024, %s555_s27, %s557_s29, %s468_s21, %s468_s21, %s469_s22  }
  0x2b   : > { %p309_p9 = scmp.ge.s32.totalorder %s465_s9, 1  ;;  %p107_p1 = scmp.lt.s32.totalorder %s465_s9, 3 }
  0x2d   : > { %p108_p3 = pnand %p309_p9, %p107_p1 }
  0x2e   : > { %s581_s23 = sand.u32 (!%p108_p3), 1, %s457_s7   ;;  %p718_p6 = scmp.ne.s32.totalorder (!%p108_p3), %s714_s17, 0 }
  0x2f   : > { %111 = sbr.rel (%p108_p3) target bundleno = 196 (0xc4), region = 24  ;;  %s310_s24 = sshll.u32 (!%p108_p3), %s581_s23, 6 }
  0x30   : > { %s114_s26 = scalar_lea.sflag (!%p108_p3), [#allocation3], %s581_s23  ;;  %s585_s30 = scalar_lea.vmem (!%p108_p3), [#allocation2], %s310_s24 }
  0x34   : > { %444 = dma.done.wait (%p718_p6), %s114_s26, 1024  }
  0x35   : > { %446 = vsyncadd (%p718_p6), %s114_s26, 4294966272  ;;  %s311_s25 = sshll.u32 %s581_s23, 7  ;;  %vm147_vm0 = vcmask 64512   ;;  %vm156_vm1 = vcmask 261312   ;;  %v470_v0 = vmov 0.0   ;;  %vm138_vm2 = vcmask 261120  }
  0x36   : > { %s592_s27 = scalar_lea.vmem [#allocation5], %s311_s25  ;;  %v167_v1 = vld [vmem:[%s585_s30 + $0x10] sm:$0xff]  ;;  %v165_v2 = vld [vmem:[%s585_s30] sm:$0xff]  ;;  %s471_s17 = smov 8   ;;  %v168_v3 = vld [vmem:[%s585_s30 + $0x18] sm:$0xff]  ;;  %vm205_vm3 = vcmask 195648  }
  0x37   : > { %150 = vst.msk [vmem:[%s592_s27 + $0x28] sm:$0xff] %vm147_vm0, %v470_v0  ;;  %148 = vst.msk [vmem:[%s592_s27 + $0x8] sm:$0xff] %vm147_vm0, %v470_v0  ;;  %185 = vrot.lane.b32.xlu1 %v167_v1, %s471_s17  ;;  %181 = vrot.lane.b32.xlu0 %v165_v2, %s471_s17  ;;  %s321_s28 = sshll.u32 %s505_s10, 11  ;;  %s229_s29 = sshll.u32 %s592_s27, 4  ;;  %s661_s29 = int_to_ptr.vmem [resolvable:$true] %s229_s29 }
  0x38   : > { %149 = vst.msk [vmem:[%s592_s27 + $0x10] sm:$0xff] %vm147_vm0, %v470_v0  ;;  %151 = vst.msk [vmem:[%s592_s27 + $0x30] sm:$0xff] %vm147_vm0, %v470_v0  ;;  %v166_v4 = vld [vmem:[%s585_s30 + $0x8] sm:$0xff]  ;;  %v169_v6 = vld [vmem:[%s585_s30 + $0x20] sm:$0xff]  ;;  %s659_s4 = scalar_lea.hbm %s710_s1, %s321_s28  ;;  %s215_s10 = scalar_lea.sflag [#allocation4], %s581_s23 }
  0x39   : > { %152 = vst.msk [vmem:[%s592_s27 + $0x48] sm:$0xff] %vm147_vm0, %v470_v0  ;;  %153 = vst.msk [vmem:[%s592_s27 + $0x50] sm:$0xff] %vm147_vm0, %v470_v0  ;;  %v170_v5 = vld [vmem:[%s585_s30 + $0x28] sm:$0xff]  ;;  %v172_v7 = vld [vmem:[%s585_s30 + $0x38] sm:$0xff]  ;;  %s401_s5 = scalar_lea.vmem %s661_s29, 2048  ;;  %p719_p12 = scmp.ne.s32.totalorder %s715_s18, 0 }
  0x3a   : > { %154 = vst.msk [vmem:[%s592_s27 + $0x68] sm:$0xff] %vm147_vm0, %v470_v0  ;;  %155 = vst.msk [vmem:[%s592_s27 + $0x70] sm:$0xff] %vm147_vm0, %v470_v0  ;;  %v171_v8 = vld [vmem:[%s585_s30 + $0x30] sm:$0xff]  ;;  %p402_p11 = scmp.ne.s32.totalorder %s661_s29, %s401_s5  ;;  %s472_s11 = smov [#allocation5]  }
  0x3b   : > { %159 = vst.msk [vmem:[%s592_s27 + $0x28] sm:$0xff] %vm156_vm1, %v470_v0  ;;  %157 = vst.msk [vmem:[%s592_s27 + $0x8] sm:$0xff] %vm156_vm1, %v470_v0  ;;  %187 = vrot.lane.b32.xlu1 %v168_v3, %s471_s17  ;;  %183 = vrot.lane.b32.xlu0 %v166_v4, %s471_s17  ;;  %s405_s13 = sshll.u32 %s472_s11, 4  ;;  %s406_s13 = int_to_ptr.vmem [resolvable:$false] %s405_s13 }
  0x3c   : > { %158 = vst.msk [vmem:[%s592_s27 + $0x10] sm:$0xff] %vm156_vm1, %v470_v0  ;;  %160 = vst.msk [vmem:[%s592_s27 + $0x30] sm:$0xff] %vm156_vm1, %v470_v0  ;;  %p403_p13 = pnand %p402_p11, %p719_p12  ;;  %s407_s14 = scalar_lea.vmem %s406_s13, 4096 }
  0x3d   : > { %161 = vst.msk [vmem:[%s592_s27 + $0x48] sm:$0xff] %vm156_vm1, %v470_v0  ;;  %162 = vst.msk [vmem:[%s592_s27 + $0x50] sm:$0xff] %vm156_vm1, %v470_v0  ;;  %p408_p5 = scmp.lt.s32.totalorder %s661_s29, %s406_s13  ;;  %p409_p7 = scmp.lt.s32.totalorder %s407_s14, %s401_s5 }
  0x3e   : > { %163 = vst.msk [vmem:[%s592_s27 + $0x68] sm:$0xff] %vm156_vm1, %v470_v0  ;;  %164 = vst.msk [vmem:[%s592_s27 + $0x70] sm:$0xff] %vm156_vm1, %v470_v0  ;;  %p404_p4 = pneg %p403_p13 }
  0x3f   : > { %139 = vst.msk [vmem:[%s592_s27] sm:$0xff] %vm138_vm2, %v470_v0  ;;  %140 = vst.msk [vmem:[%s592_s27 + $0x20] sm:$0xff] %vm138_vm2, %v470_v0  ;;  %191 = vrot.lane.b32.xlu1 %v170_v5, %s471_s17  ;;  %189 = vrot.lane.b32.xlu0 %v169_v6, %s471_s17  ;;  %p410_p8 = por %p409_p7, %p408_p5 }
  0x40   : > { %141 = vst.msk [vmem:[%s592_s27 + $0x40] sm:$0xff] %vm138_vm2, %v470_v0  ;;  %142 = vst.msk [vmem:[%s592_s27 + $0x60] sm:$0xff] %vm138_vm2, %v470_v0 }
  0x41   : > { %143 = vst.msk [vmem:[%s592_s27 + $0x18] sm:$0xff] %vm138_vm2, %v470_v0  ;;  %144 = vst.msk [vmem:[%s592_s27 + $0x38] sm:$0xff] %vm138_vm2, %v470_v0  ;;  %p411_p10 = pnand %p410_p8, %p404_p4 }
  0x42   : > { %145 = vst.msk [vmem:[%s592_s27 + $0x58] sm:$0xff] %vm138_vm2, %v470_v0  ;;  %146 = vst.msk [vmem:[%s592_s27 + $0x78] sm:$0xff] %vm138_vm2, %v470_v0 }
  0x43   : > { %195 = vrot.lane.b32.xlu1 %v172_v7, %s471_s17  ;;  %193 = vrot.lane.b32.xlu0 %v171_v8, %s471_s17 }
  0xa9   : > { %v186_v9 = vpop.permute.xlu1 %185  ;;  %v182_v10 = vpop.permute.xlu0 %181 }
  0xaa   : > { %208 = vst.msk [vmem:[%s592_s27 + $0x28] sm:$0xff] %vm205_vm3, %v186_v9  ;;  %206 = vst.msk [vmem:[%s592_s27 + $0x8] sm:$0xff] %vm205_vm3, %v182_v10 }
  0xad   : > { %v188_v11 = vpop.permute.xlu1 %187  ;;  %v184_v12 = vpop.permute.xlu0 %183 }
  0xae   : > { %209 = vst.msk [vmem:[%s592_s27 + $0x30] sm:$0xff] %vm205_vm3, %v188_v11  ;;  %207 = vst.msk [vmem:[%s592_s27 + $0x10] sm:$0xff] %vm205_vm3, %v184_v12 }
  0xb1   : > { %v192_v13 = vpop.permute.xlu1 %191  ;;  %v190_v14 = vpop.permute.xlu0 %189 }
  0xb2   : > { %211 = vst.msk [vmem:[%s592_s27 + $0x50] sm:$0xff] %vm205_vm3, %v192_v13  ;;  %210 = vst.msk [vmem:[%s592_s27 + $0x48] sm:$0xff] %vm205_vm3, %v190_v14 }
  0xb5   : > { %v196_v15 = vpop.permute.xlu1 %195  ;;  %v194_v16 = vpop.permute.xlu0 %193 }
  0xb6   : > { %213 = vst.msk [vmem:[%s592_s27 + $0x70] sm:$0xff] %vm205_vm3, %v196_v15  ;;  %212 = vst.msk [vmem:[%s592_s27 + $0x68] sm:$0xff] %vm205_vm3, %v194_v16 }
  0xb7   : > { %414 = shalt.err (!%p411_p10)
}
  0xb8   : > { %s415_s16 = scalar_lea.hbm %s659_s4, 2048  ;;  %s419_s22 = scalar_lea.hbm %s710_s1, 4096 }
  0xb9   : > { %p416_p0 = scmp.ne.s32.totalorder %s659_s4, %s415_s16  ;;  %p420_p1 = scmp.lt.s32.totalorder %s659_s4, %s710_s1 }
  0xba   : > { %p421_p3 = scmp.lt.s32.totalorder %s419_s22, %s415_s16 }
  0xbb   : > { %p417_p2 = pnand %p416_p0, %p719_p12 }
  0xbc   : > { %p422_p6 = por %p421_p3, %p420_p1 }
  0xbd   : > { %p418_p9 = pneg %p417_p2 }
  0xbf   : > { %p423_p11 = pnand %p422_p6, %p418_p9 }
  0xc1   : > { %426 = shalt.err (!%p423_p11)
}
  0xc2   : > { %s473_s30 = smov 128  }
  0xc3   : > { %324 = dma.vmem_to_hbm [thread:$0]  (%p719_p12), %s661_s29, 2048, %s659_s4, %s215_s10, %s473_s30, %s473_s30, %s471_s17  }
  0xc4 PF: > { %s244_s25 = sand.u32 1, %s453_s6   ;;  %p720_p13 = scmp.ne.s32.totalorder %s716_s19, 0 }
  0xc5   : > { %p721_p4 = scmp.ge.s32.totalorder %s465_s9, 2  ;;  %s245_s27 = scalar_lea.sflag [#allocation4], %s244_s25 }
  0xc7   : > { %p331_p5 = pnand %p721_p4, %p720_p13 }
  0xc9   : > { %p332_p7 = pneg %p331_p5 }
  0xcb   : > { %448 = dma.done.wait (%p332_p7), %s245_s27, 2048  }
  0xcc   : > { %450 = vsyncadd (%p332_p7), %s245_s27, 4294965248  ;;  %p14_p8 = scmp.ge.s32.totalorder %s509_s12, 4   ;;  %s722_s6 = smov %s457_s7 }
  0xcd   : > { %s723_s7 = smov %s461_s8  ;;  %s724_s8 = smov %s521_s15 }
  0xce   : > { %s725_s9 = smov %s509_s12  ;;  %16 = sbr.rel (!%p14_p8) target bundleno = 5 (0x5), region = 69 }
  0xd3   :  { %250 = vsyncpa [#allocation3], 1 }
  0xd4   :  { %252 = vsyncpa [#allocation3 + $0x1], 1 }
  0xd5   :  { %253 = vsyncpa [#allocation4], 1 }
  0xd6   :  { %255 = vsyncpa [#allocation4 + $0x1], 1 }

</bundles_post_ra>
